<compile_context>
chip_gen: v7x
topology: tpu7x:2x2x1
jax: 0.10.0
libtpu: 0.0.40
codegen_flags: <defaults>
</compile_context>

<pallas_src>
import math

import jax
import jax.numpy as jnp
from jax.experimental import pallas as pl
from jax.experimental.pallas import tpu as pltpu


# ----------------------------------------------------------------------------- kernel

def data_embedding_kernel(x_ref, w_ref, pb_ref, o_ref):
    # x_ref : (Bt, L, C)    value input block
    # w_ref : (C, D)        pointwise conv weight (transposed Conv1d weight)
    # pb_ref: (L, D)        positional embedding + conv bias (pre-summed in wrapper)
    # o_ref : (Bt, L, D)    output block
    bt, L, C = x_ref.shape
    D = w_ref.shape[1]

    # Single MXU pass over the whole batch block (M = Bt*L, K = C, N = D).
    x2 = x_ref[...].reshape(bt * L, C)
    y = jnp.dot(x2, w_ref[...], preferred_element_type=jnp.float32)   # (Bt*L, D) f32

    # Fused epilogue: add (bias + positional embedding), broadcast over the batch dim.
    y = y.reshape(bt, L, D) + pb_ref[...]
    o_ref[...] = y.astype(o_ref.dtype)


# ----------------------------------------------------------------------------- helpers

def sinusoidal_pe(seq_len, d_model):
    """Matches PyTorch PositionalEmbedding buffer pe[:seq_len, :d_model]."""
    position = jnp.arange(seq_len, dtype=jnp.float32)[:, None]                  # (L, 1)
    div_term = jnp.exp(jnp.arange(0, d_model, 2, dtype=jnp.float32)
                       * (-math.log(10000.0) / d_model))                        # (ceil(D/2),)
    pe = jnp.zeros((seq_len, d_model), jnp.float32)
    pe = pe.at[:, 0::2].set(jnp.sin(position * div_term))
    if d_model % 2 == 0:
        pe = pe.at[:, 1::2].set(jnp.cos(position * div_term))
    else:
        pe = pe.at[:, 1::2].set(jnp.cos(position * div_term[:-1]))
    return pe


def _pick_block_batch(B, L, C, D, itemsize=4, budget_bytes=24 << 20):
    """Largest divisor of B whose double-buffered VMEM footprint fits the budget,
    while keeping >= 2 grid steps so both v7x TensorCores get work."""
    c_pad = ((max(C, 1) + 127) // 128) * 128           # lane padding of the x block
    d_pad = ((max(D, 1) + 127) // 128) * 128
    l_pad = ((max(L, 1) + 7) // 8) * 8
    per_b = 2 * l_pad * c_pad * itemsize + 2 * l_pad * d_pad * itemsize
    bt = max(1, min(B, budget_bytes // max(per_b, 1)))
    if B >= 2:
        bt = min(bt, max(1, B // 2))                   # keep grid length >= 2
    while B % bt != 0:                                 # avoid ragged final block
        bt -= 1
    return bt


# ----------------------------------------------------------------------------- wrapper

@jax.jit
def data_embedding_freq(x, weight, bias):
    """x: (B, L, c_in) f32; weight: (d_model, c_in, 1) (PyTorch Conv1d layout); bias: (d_model,)."""
    B, L, C = x.shape
    D = weight.shape[0]

    w = jnp.transpose(weight[:, :, 0], (1, 0))                 # (C, D)
    pe_bias = sinusoidal_pe(L, D) + bias[None, :]              # (L, D): PE + conv bias, fused

    Bt = _pick_block_batch(B, L, C, D, itemsize=x.dtype.itemsize)
    grid = (B // Bt,)

    return pl.pallas_call(
        data_embedding_kernel,
        out_shape=jax.ShapeDtypeStruct((B, L, D), x.dtype),
        grid=grid,
        in_specs=[
            # Full trailing (L, C) extents -> one contiguous HBM slab per step.
            pl.BlockSpec((Bt, L, C), lambda b: (b, 0, 0)),
            pl.BlockSpec((C, D), lambda b: (0, 0)),            # resident weight
            pl.BlockSpec((L, D), lambda b: (0, 0)),            # resident PE + bias
        ],
        out_specs=pl.BlockSpec((Bt, L, D), lambda b: (b, 0, 0)),
        compiler_params=pltpu.CompilerParams(
            dimension_semantics=("parallel",),                 # shard batch blocks over TCs
            vmem_limit_bytes=48 * 1024 * 1024,                 # < v7x 64 MiB physical
        ),
    )(x, w, pe_bias)


# ----------------------------------------------------------------------------- init + reference

def init_params(key, c_in, d_model):
    k_w, k_b = jax.random.split(key)
    # kaiming_normal_(weight, mode='fan_in', nonlinearity='leaky_relu') with a=0: gain=sqrt(2)
    fan_in = c_in * 1
    std = math.sqrt(2.0) / math.sqrt(fan_in)
    weight = std * jax.random.normal(k_w, (d_model, c_in, 1), dtype=jnp.float32)
    # Conv1d default bias init: U(-1/sqrt(fan_in), 1/sqrt(fan_in))
    bound = 1.0 / math.sqrt(fan_in)
    bias = jax.random.uniform(k_b, (d_model,), minval=-bound, maxval=bound, dtype=jnp.float32)
    return weight, bias


def reference(x, weight, bias):
    # Pure-JAX reference of the PyTorch forward (eval mode: dropout = identity).
    B, L, C = x.shape
    D = weight.shape[0]
    val = jnp.einsum("blc,dc->bld", x, weight[:, :, 0]) + bias[None, None, :]
    pe = sinusoidal_pe(L, D)
    return val + pe[None]


# ----------------------------------------------------------------------------- test

if __name__ == "__main__":
    key = jax.random.PRNGKey(0)
    k_x, k_p = jax.random.split(key)

    B, L, c_in, d_model = 2, 16, 4, 32
    x = jax.random.normal(k_x, (B, L, c_in), dtype=jnp.float32)
    weight, bias = init_params(k_p, c_in, d_model)

    out = data_embedding_freq(x, weight, bias)
    out = jax.block_until_ready(out)

    ref = reference(x, weight, bias)
    assert out.shape == (B, L, d_model), out.shape
    assert jnp.allclose(out, ref, atol=1e-4, rtol=1e-4), float(jnp.max(jnp.abs(out - ref)))

    print("KERNEL_OK")
</pallas_src>

<mosaic_0001>
module attributes {stable_mosaic.version = 11 : i64} {
  func.func @data_embedding_kernel(%arg0: i32, %arg1: memref<1x16x4xf32, #tpu.memory_space<vmem>>, %arg2: memref<4x32xf32, #tpu.memory_space<vmem>>, %arg3: memref<16x32xf32, #tpu.memory_space<vmem>>, %arg4: memref<1x16x32xf32, #tpu.memory_space<vmem>>) attributes {dimension_semantics = [#tpu.dimension_semantics<parallel>], iteration_bounds = array<i64: 2>, scalar_prefetch = 0 : i64, scratch_operands = 0 : i64, tpu.core_type = #tpu.core_type<tc>, window_params = [{transform_indices = @transform_0, window_bounds = array<i64: 1, 16, 4>}, {pipeline_mode = #tpu.pipeline_mode<synchronous>, transform_indices = @transform_1, window_bounds = array<i64: 4, 32>}, {pipeline_mode = #tpu.pipeline_mode<synchronous>, transform_indices = @transform_2, window_bounds = array<i64: 16, 32>}, {transform_indices = @transform_3, window_bounds = array<i64: 1, 16, 32>}]} {
    %c0 = arith.constant 0 : index
    %c0_0 = arith.constant 0 : index
    %c0_1 = arith.constant 0 : index
    %0 = vector.load %arg1[%c0, %c0_0, %c0_1] : memref<1x16x4xf32, #tpu.memory_space<vmem>>, vector<1x16x4xf32>
    %1 = vector.shape_cast %0 : vector<1x16x4xf32> to vector<16x4xf32>
    %c0_2 = arith.constant 0 : index
    %c0_3 = arith.constant 0 : index
    %2 = vector.load %arg2[%c0_2, %c0_3] : memref<4x32xf32, #tpu.memory_space<vmem>>, vector<4x32xf32>
    %cst = arith.constant dense<0.000000e+00> : vector<16x32xf32>
    %3 = tpu.matmul %1, %2, %cst {dimension_numbers = #tpu.dot_dimension_numbers<[1], [0], [0], [1], [0, 0, 1, 1], [], []>} : vector<16x4xf32>, vector<4x32xf32>, vector<16x32xf32> -> vector<16x32xf32>
    %4 = vector.shape_cast %3 : vector<16x32xf32> to vector<1x16x32xf32>
    %c0_4 = arith.constant 0 : index
    %c0_5 = arith.constant 0 : index
    %5 = vector.load %arg3[%c0_4, %c0_5] : memref<16x32xf32, #tpu.memory_space<vmem>>, vector<16x32xf32>
    %6 = vector.shape_cast %5 : vector<16x32xf32> to vector<1x16x32xf32>
    %7 = arith.addf %4, %6 : vector<1x16x32xf32>
    %c0_6 = arith.constant 0 : index
    %c0_7 = arith.constant 0 : index
    %c0_8 = arith.constant 0 : index
    %8 = vector.load %arg4[%c0_6, %c0_7, %c0_8] : memref<1x16x32xf32, #tpu.memory_space<vmem>>, vector<1x16x32xf32>
    tpu.vector_store %arg4[%c0_6, %c0_7, %c0_8], %7 {strides = array<i32>} : memref<1x16x32xf32, #tpu.memory_space<vmem>>, vector<1x16x32xf32>,
    return
  }
  func.func @transform_0(%arg0: i32) -> (i32, i32, i32) {
    %c0_i32 = arith.constant 0 : i32
    %c0_i32_0 = arith.constant 0 : i32
    %c0_i32_1 = arith.constant 0 : i32
    return %arg0, %c0_i32, %c0_i32_0 : i32, i32, i32
  }
  func.func @transform_1(%arg0: i32) -> (i32, i32) {
    %c0_i32 = arith.constant 0 : i32
    %c0_i32_0 = arith.constant 0 : i32
    %c0_i32_1 = arith.constant 0 : i32
    return %c0_i32, %c0_i32_0 : i32, i32
  }
  func.func @transform_2(%arg0: i32) -> (i32, i32) {
    %c0_i32 = arith.constant 0 : i32
    %c0_i32_0 = arith.constant 0 : i32
    %c0_i32_1 = arith.constant 0 : i32
    return %c0_i32, %c0_i32_0 : i32, i32
  }
  func.func @transform_3(%arg0: i32) -> (i32, i32, i32) {
    %c0_i32 = arith.constant 0 : i32
    %c0_i32_0 = arith.constant 0 : i32
    %c0_i32_1 = arith.constant 0 : i32
    return %arg0, %c0_i32, %c0_i32_0 : i32, i32, i32
  }
}

</mosaic_0001>

<bundles_post_ra>
// kernel: data_embedding_freq.1
= control target key start
LH: loop header
LB: loop body
LE: loop exit
PB: predicated region body
PF: predicated region fallthrough
CT: control target
= control target key end

     0   :  { %8 = vsyncpa [#allocation3], 0  ;;  %s606_s0 = inlined_call_operand.vmem [shape: f32[2,16,4], index: 0, kind: input, shape index: {}]   ;;  %s607_s1 = inlined_call_operand.vmem [shape: f32[4,32], index: 1, kind: input, shape index: {}]   ;;  %s608_s2 = inlined_call_operand.vmem [shape: f32[16,32], index: 2, kind: input, shape index: {}]   ;;  %s609_s3 = inlined_call_operand.hbm [shape: f32[2,16,32], index: 3, kind: output, shape index: {}]  }
   0x1   :  { %10 = vsyncpa [#allocation3 + $0x1], 0  ;;  %s494_s12 = smov 0   ;;  %s496_s13 = smov 0  }
   0x2   :  { %s498_s14 = smov 0   ;;  %s500_s15 = smov 0  }
   0x3 LB: > { %s515_s16 = sadd.s32 4294967295, %s469_s15   ;;  %s341_s17 = sadd.s32 4294967294, %s469_s15   ;;  %s469_s15 = sphi %s500_s15, %s615_s15   ;;  %s465_s14 = sphi %s498_s14, %s614_s14   ;;  %s461_s13 = sphi %s496_s13, %s613_s13   ;;  %s457_s12 = sphi %s494_s12, %s612_s12  }
   0x4   : > { %s519_s18 = sadd.s32 1, %s469_s15   ;;  %s91_s19 = sadd.s32 1, %s465_s14 }
   0x5   : > { %s88_s20 = ssub.s32 %s469_s15, %s519_s18  ;;  %p101_p0 = scmp.ne.s32.totalorder %s465_s14, %s461_s13 }
   0x6   : > { %p89_p1 = scmp.eq.s32.totalorder %s88_s20, 0  ;;  %p102_p2 = scmp.eq.s32.totalorder %s515_s16, 1 }
   0x7   : > { %p107_p3 = scmp.ne.s32.totalorder %s461_s13, %s457_s12  ;;  %p108_p4 = scmp.eq.s32.totalorder %s341_s17, 1 }
   0x8   : > { %s530_s21 = scalar_select %p89_p1, %s465_s14, %s91_s19  }
   0x9   : > { %p532_p5 = por %p102_p2, %p101_p0  ;;  %p536_p6 = por %p108_p4, %p107_p3 }
   0xa   : > { %p344_p7 = scmp.ge.s32.totalorder %s469_s15, 1  ;;  %p140_p8 = scmp.lt.s32.totalorder %s469_s15, 3 }
   0xc   : > { %p141_p9 = pnand %p344_p7, %p140_p8 }
   0xd   : > { %v171_v0 = vld [vmem:[%s607_s1] sm:$0xf] (!%p141_p9)  ;;  %vm179_vm0 = vcmask (!%p141_p9), 1043456   ;;  %p164_p10 = scmp.lt.s32.totalorder (!%p141_p9), %s515_s16, 1  ;;  %vm172_vm1 = vcmask (!%p141_p9), 31744   ;;  %s161_s4 = sand.u32 (!%p141_p9), 1, %s461_s13  }
   0xe   : > { %144 = sbr.rel (%p141_p9) target bundleno = 257 (0x101), region = 32  ;;  %361 = vmatprep.subr.msk.mxu0 (!%p141_p9), %vm179_vm0, %v171_v0  ;;  %s345_s5 = sshll.u32 (!%p141_p9), %s161_s4, 4  ;;  %v259_v3 = vld [vmem:[%s608_s2 + $0x8] sm:$0xff] (!%p141_p9)  ;;  %v258_v4 = vld [vmem:[%s608_s2] sm:$0xff] (!%p141_p9)  ;;  %vm262_vm2 = vcmask (!%p141_p9), 261120  }
   0xf   : > { %362 = vmatpush3.msk.msra.mxu0 (!%p141_p9), %vm179_vm0, %v171_v0  ;;  %s163_s8 = scalar_lea.vmem (!%p141_p9), [#allocation2], %s345_s5  ;;  %s357_s10 = sshll.u32 (!%p141_p9), %s515_s16, 8 }
  0x10   : > { %s279_s9 = sshll.u32 (!%p141_p9), %s163_s8, 4  ;;  %s563_s24 = scalar_lea.hbm (!%p141_p9), %s609_s3, %s357_s10  ;;  %s558_s9 = int_to_ptr.vmem [resolvable:$true] %s279_s9 }
  0x11   : > { %s407_s25 = scalar_lea.vmem (!%p141_p9), %s558_s9, 256 }
  0x12   : > { %p408_p11 = scmp.ne.s32.totalorder (!%p141_p9), %s558_s9, %s407_s25 }
  0x14   : > { %p409_p12 = pnand (!%p141_p9), %p408_p11, %p532_p5 }
  0x15   : > { %s165_s26 = scalar_select %p164_p10, %s515_s16, 1 }
  0x16   : > { %s565_s16 = scalar_lea.sflag [#allocation3], %s161_s4  ;;  %p410_p13 = pneg %p409_p12 }
  0x17   : > { %s356_s27 = sshll.u32 %s165_s26, 4  ;;  %s471_s26 = smov [#allocation2]  }
  0x18   : > { %s168_s30 = scalar_lea.vmem %s606_s0, %s356_s27  ;;  %s411_s27 = sshll.u32 %s471_s26, 4  ;;  %s412_s27 = int_to_ptr.vmem [resolvable:$false] %s411_s27 }
  0x19   : > { %v169_v1 = vld [vmem:[%s168_s30] sm:$0xff]  ;;  %v170_v2 = vld [vmem:[%s168_s30 + $0x8] sm:$0xff]  ;;  %s413_s28 = scalar_lea.vmem %s412_s27, 512  ;;  %p414_p0 = scmp.lt.s32.totalorder %s558_s9, %s412_s27 }
  0x1a   : > { %363 = vmatprep.mubr.msk.f32.mxu0 %vm172_vm1, %v169_v1  ;;  %p415_p1 = scmp.lt.s32.totalorder %s413_s28, %s407_s25 }
  0x1b   : > { %364 = vmatmul.mubr.msk.f32.vlgmr.msra.gmra.mrb[0].mxu0 %vm172_vm1, %v170_v2 }
  0x1c   : > { %p416_p2 = por %p415_p1, %p414_p0 }
  0x1e   : > { %p417_p3 = pnand %p416_p2, %p410_p13 }
  0xee   : > { %v365_v5 = vpop.f32.mrb[0].mxu0 }
  0xef   : > { %v261_v6 = vadd.f32 %v365_v5, %v259_v3  ;;  %v249_v7 = vpop.f32.mrb[1].mxu0 }
  0xf0   : > { %v260_v8 = vadd.f32 %v258_v4, %v249_v7 }
  0xf1   : > { %264 = vst.msk [vmem:[%s163_s8 + $0x8] sm:$0xff] %vm262_vm2, %v261_v6 }
  0xf2   : > { %263 = vst.msk [vmem:[%s163_s8] sm:$0xff] %vm262_vm2, %v260_v8 }
  0xf3   : > { %420 = shalt.err (!%p417_p3)
}
  0xf4   : > { %s421_s29 = scalar_lea.hbm %s563_s24, 256  ;;  %s425_s5 = scalar_lea.hbm %s609_s3, 512 }
  0xf5   : > { %p422_p4 = scmp.ne.s32.totalorder %s563_s24, %s421_s29  ;;  %p426_p9 = scmp.lt.u32.totalorder %s563_s24, %s609_s3 }
  0xf6   : > { %p427_p10 = scmp.lt.u32.totalorder %s425_s5, %s421_s29  ;;  %p429_p12 = scmp.lt.u32.totalorder %s421_s29, %s563_s24 }
  0xf7   : > { %p423_p7 = pnand %p422_p4, %p532_p5 }
  0xf8   : > { %p428_p11 = por %p427_p10, %p426_p9 }
  0xf9   : > { %p424_p8 = pneg %p423_p7 }
  0xfa   : > { %p430_p13 = por %p429_p12, %p428_p11 }
  0xfc   : > { %p431_p0 = pnand %p430_p13, %p424_p8 }
  0xfe   : > { %434 = shalt.err (!%p431_p0)
}
  0xff   : > { %s472_s8 = smov 128   ;;  %s473_s10 = smov 8  }
 0x100   : > { %366 = dma.vmem_to_hbm [thread:$0]  (%p532_p5), %s558_s9, 256, %s563_s24, %s565_s16, %s472_s8, %s472_s8, %s473_s10  }
 0x101 PF: > { %p372_p1 = scmp.ge.s32.totalorder %s469_s15, 2  ;;  %s294_s11 = sand.u32 1, %s457_s12  }
 0x102   : > { %s295_s17 = scalar_lea.sflag [#allocation3], %s294_s11 }
 0x103   : > { %p369_p2 = pnand %p372_p1, %p536_p6 }
 0x105   : > { %452 = dma.done.wait (!%p369_p2), %s295_s17, 256  }
 0x106   : > { %454 = vsyncadd (!%p369_p2), %s295_s17, 4294967040  ;;  %p13_p3 = scmp.ge.s32.totalorder %s519_s18, 4   ;;  %s612_s12 = smov %s461_s13 }
 0x107   : > { %s613_s13 = smov %s465_s14  ;;  %s614_s14 = smov %s530_s21 }
 0x108   : > { %s615_s15 = smov %s519_s18  ;;  %15 = sbr.rel (!%p13_p3) target bundleno = 3 (0x3), region = 67 }
 0x10f   :  { %300 = vsyncpa [#allocation3], 1 }
 0x110   :  { %302 = vsyncpa [#allocation3 + $0x1], 1 }

</bundles_post_ra>
